<compile_context>
chip_gen: v6e
topology: v6e:2x2x1
jax: 0.10.0
libtpu: 0.0.40
codegen_flags: <defaults>
</compile_context>

<pallas_src>
import jax
import jax.numpy as jnp
from jax.experimental import pallas as pl
from jax.experimental.pallas import tpu as pltpu


def rnn_seq_kernel(x_ref, cat_ref, h0_ref,
                   w_c_ref, w_i_ref, w_h_ref, b_fused_ref,
                   w_o2o_ref, b_o2o_ref,
                   out_ref, hid_out_ref,
                   slab_ref, h_scratch):
    T, B, _ = x_ref.shape
    H = h_scratch.shape[1]

    # Time-invariant category contribution + fused i2h|i2o bias, computed ONCE.
    cat_term = (
        jnp.dot(cat_ref[...], w_c_ref[...], preferred_element_type=jnp.float32)
        + b_fused_ref[...]
    )  # (B, H+O)

    h_scratch[...] = h0_ref[...]

    # Sequential hidden chain — the only part with a loop dependence.
    @pl.loop(0, T, unroll=True)
    def _(t):
        h = h_scratch[...]
        fused = (
            jnp.dot(x_ref[t], w_i_ref[...], preferred_element_type=jnp.float32)
            + jnp.dot(h, w_h_ref[...], preferred_element_type=jnp.float32)
            + cat_term
        )  # (B, H+O) == cat(hidden_new, out1)
        slab_ref[pl.ds(t * B, B), :] = fused
        h_scratch[...] = fused[:, :H]     # carried hidden = first H lanes

    hid_out_ref[...] = h_scratch[...]

    # Batched, non-recurrent epilogue over all T*B rows:
    # o2o + bias + (eval-mode) dropout + stable log-softmax, one store.
    o2 = (
        jnp.dot(slab_ref[...], w_o2o_ref[...], preferred_element_type=jnp.float32)
        + b_o2o_ref[...]
    )  # (T*B, O)
    # Dropout(p=0.1): identity in eval/inference mode.
    # TODO(synk): training-mode dropout would need pltpu.prng_seed/prng_random_bits.
    m = jnp.max(o2, axis=1, keepdims=True)
    z = o2 - m
    lse = jnp.log(jnp.sum(jnp.exp(z), axis=1, keepdims=True))
    out_ref[...] = z - lse


def rnn_forward_sequence(category, inputs, hidden0, params):
    """Run the RNN cell over a whole sequence in ONE kernel invocation.

    category: (B, C) float32   (constant across the sequence, like the tutorial)
    inputs:   (T, B, I) float32
    hidden0:  (B, H) float32
    Returns:  (outputs (T, B, O) log-probs, hidden_T (B, H))
    """
    T, B, _ = inputs.shape
    H = hidden0.shape[1]
    O = params["b_o2o"].shape[1]
    HO = H + O

    out_flat, hid_T = pl.pallas_call(
        rnn_seq_kernel,
        out_shape=(
            jax.ShapeDtypeStruct((T * B, O), jnp.float32),
            jax.ShapeDtypeStruct((B, H), jnp.float32),
        ),
        scratch_shapes=[
            pltpu.VMEM((T * B, HO), jnp.float32),   # stacked cat(hidden_new, out1) rows
            pltpu.VMEM((B, H), jnp.float32),        # carried hidden
        ],
    )(inputs, category, hidden0,
      params["w_c"], params["w_i"], params["w_h"], params["b_fused"],
      params["w_o2o"], params["b_o2o"])

    return out_flat.reshape(T, B, O), hid_T


def rnn_cell(category, inputs, hidden, params):
    """Single-step forward, exactly the PyTorch module's forward signature."""
    out, hid = rnn_forward_sequence(category, inputs[None], hidden, params)
    return out[0], hid


def init_params(key, n_categories, input_size, hidden_size, output_size):
    """Synthetic init mimicking nn.Linear's U(-1/sqrt(fan_in), +).

    Weights stored pre-transposed (in_features, out_features); i2h/i2o are
    fused along the output dim and split by input rows (category / input /
    hidden) so the category rows can be hoisted out of the time loop.
    """
    ks = jax.random.split(key, 3)
    in_ih = n_categories + input_size + hidden_size
    in_oo = hidden_size + output_size

    def lin(k, fan_in, fan_out):
        bound = 1.0 / jnp.sqrt(fan_in)
        kw, kb = jax.random.split(k)
        w = jax.random.uniform(kw, (fan_in, fan_out), jnp.float32, -bound, bound)
        b = jax.random.uniform(kb, (1, fan_out), jnp.float32, -bound, bound)
        return w, b

    w_i2h, b_i2h = lin(ks[0], in_ih, hidden_size)
    w_i2o, b_i2o = lin(ks[1], in_ih, output_size)
    w_o2o, b_o2o = lin(ks[2], in_oo, output_size)

    C, I = n_categories, input_size
    # fuse i2h|i2o along the output dim: x @ w_fused == cat(hidden_new, out1)
    w_fused = jnp.concatenate([w_i2h, w_i2o], axis=1)   # (C+I+H, H+O)
    b_fused = jnp.concatenate([b_i2h, b_i2o], axis=1)   # (1, H+O)

    return {
        "w_c": w_fused[:C],          # category rows (hoisted out of the loop)
        "w_i": w_fused[C:C + I],     # per-step input rows
        "w_h": w_fused[C + I:],      # hidden rows
        "b_fused": b_fused,
        "w_o2o": w_o2o,
        "b_o2o": b_o2o,
        # unfused copies kept only for the pure-JAX reference check
        "_w_i2h": w_i2h, "_b_i2h": b_i2h,
        "_w_i2o": w_i2o, "_b_i2o": b_i2o,
    }


if __name__ == "__main__":
    # small synthetic sizes; B=8 fills a full sublane group
    B = 8
    n_categories = 8
    input_size = 16
    hidden_size = 32
    output_size = 16
    T = 8            # sequence length (entire sequence in one kernel invocation)

    key = jax.random.PRNGKey(0)
    kp, kc, ki = jax.random.split(key, 3)

    params = init_params(kp, n_categories, input_size, hidden_size, output_size)

    category = jax.random.normal(kc, (B, n_categories), jnp.float32)
    inputs = jax.random.normal(ki, (T, B, input_size), jnp.float32)
    hidden0 = jnp.zeros((B, hidden_size), jnp.float32)   # RNN.initHidden()

    outputs, hid_T = rnn_forward_sequence(category, inputs, hidden0, params)
    jax.block_until_ready((outputs, hid_T))

    # pure-JAX reference: unfused per-step loop matching the PyTorch forward
    h = hidden0
    ref_outs = []
    for t in range(T):
        x = jnp.concatenate([category, inputs[t], h], axis=1)
        h_new = x @ params["_w_i2h"] + params["_b_i2h"]
        o1 = x @ params["_w_i2o"] + params["_b_i2o"]
        o2 = jnp.concatenate([h_new, o1], axis=1) @ params["w_o2o"] + params["b_o2o"]
        ref_outs.append(o2 - jax.scipy.special.logsumexp(o2, axis=1, keepdims=True))
        h = h_new
    ref_outs = jnp.stack(ref_outs)

    assert jnp.allclose(hid_T, h, atol=1e-4, rtol=1e-4)
    assert jnp.allclose(outputs, ref_outs, atol=1e-4, rtol=1e-4)

    # also exercise the single-step wrapper (module's exact forward signature)
    out_step, hid_step = rnn_cell(category, inputs[0], hidden0, params)
    jax.block_until_ready((out_step, hid_step))
    assert jnp.allclose(out_step, ref_outs[0], atol=1e-4, rtol=1e-4)

    print("KERNEL_OK")
</pallas_src>

<mosaic_0001>
module attributes {stable_mosaic.version = 11 : i64} {
  func.func @rnn_seq_kernel(%arg0: memref<8x8x16xf32, #tpu.memory_space<vmem>>, %arg1: memref<8x8xf32, #tpu.memory_space<vmem>>, %arg2: memref<8x32xf32, #tpu.memory_space<vmem>>, %arg3: memref<8x48xf32, #tpu.memory_space<vmem>>, %arg4: memref<16x48xf32, #tpu.memory_space<vmem>>, %arg5: memref<32x48xf32, #tpu.memory_space<vmem>>, %arg6: memref<1x48xf32, #tpu.memory_space<vmem>>, %arg7: memref<48x16xf32, #tpu.memory_space<vmem>>, %arg8: memref<1x16xf32, #tpu.memory_space<vmem>>, %arg9: memref<64x16xf32, #tpu.memory_space<vmem>>, %arg10: memref<8x32xf32, #tpu.memory_space<vmem>>, %arg11: memref<64x48xf32, #tpu.memory_space<vmem>>, %arg12: memref<8x32xf32, #tpu.memory_space<vmem>>) attributes {dimension_semantics = [], scalar_prefetch = 0 : i64, scratch_operands = 2 : i64, tpu.core_type = #tpu.core_type<tc>} {
    %c0 = arith.constant 0 : index
    %c0_0 = arith.constant 0 : index
    %0 = vector.load %arg1[%c0, %c0_0] : memref<8x8xf32, #tpu.memory_space<vmem>>, vector<8x8xf32>
    %c0_1 = arith.constant 0 : index
    %c0_2 = arith.constant 0 : index
    %1 = vector.load %arg3[%c0_1, %c0_2] : memref<8x48xf32, #tpu.memory_space<vmem>>, vector<8x48xf32>
    %cst = arith.constant dense<0.000000e+00> : vector<8x48xf32>
    %2 = tpu.matmul %0, %1, %cst {dimension_numbers = #tpu.dot_dimension_numbers<[1], [0], [0], [1], [0, 0, 1, 1], [], []>} : vector<8x8xf32>, vector<8x48xf32>, vector<8x48xf32> -> vector<8x48xf32>
    %c0_3 = arith.constant 0 : index
    %c0_4 = arith.constant 0 : index
    %3 = vector.load %arg6[%c0_3, %c0_4] : memref<1x48xf32, #tpu.memory_space<vmem>>, vector<1x48xf32>
    %4 = vector.broadcast %3 : vector<1x48xf32> to vector<8x48xf32>
    %5 = arith.addf %2, %4 : vector<8x48xf32>
    %c0_5 = arith.constant 0 : index
    %c0_6 = arith.constant 0 : index
    %6 = vector.load %arg2[%c0_5, %c0_6] : memref<8x32xf32, #tpu.memory_space<vmem>>, vector<8x32xf32>
    %c0_7 = arith.constant 0 : index
    %c0_8 = arith.constant 0 : index
    %7 = vector.load %arg12[%c0_7, %c0_8] : memref<8x32xf32, #tpu.memory_space<vmem>>, vector<8x32xf32>
    tpu.vector_store %arg12[%c0_7, %c0_8], %6 {strides = array<i32>} : memref<8x32xf32, #tpu.memory_space<vmem>>, vector<8x32xf32>,
    %c0_i32 = arith.constant 0 : i32
    %c1_i32 = arith.constant 1 : i32
    %8 = arith.muli %c0_i32, %c1_i32 : i32
    %c0_i32_9 = arith.constant 0 : i32
    %9 = arith.addi %c0_i32_9, %8 : i32
    %c0_10 = arith.constant 0 : index
    %c0_11 = arith.constant 0 : index
    %10 = vector.load %arg12[%c0_10, %c0_11] : memref<8x32xf32, #tpu.memory_space<vmem>>, vector<8x32xf32>
    %11 = arith.index_cast %9 : i32 to index
    %c0_12 = arith.constant 0 : index
    %c0_13 = arith.constant 0 : index
    %12 = vector.load %arg0[%11, %c0_12, %c0_13] : memref<8x8x16xf32, #tpu.memory_space<vmem>>, vector<1x8x16xf32>
    %13 = vector.shape_cast %12 : vector<1x8x16xf32> to vector<8x16xf32>
    %c0_14 = arith.constant 0 : index
    %c0_15 = arith.constant 0 : index
    %14 = vector.load %arg4[%c0_14, %c0_15] : memref<16x48xf32, #tpu.memory_space<vmem>>, vector<16x48xf32>
    %cst_16 = arith.constant dense<0.000000e+00> : vector<8x48xf32>
    %15 = tpu.matmul %13, %14, %cst_16 {dimension_numbers = #tpu.dot_dimension_numbers<[1], [0], [0], [1], [0, 0, 1, 1], [], []>} : vector<8x16xf32>, vector<16x48xf32>, vector<8x48xf32> -> vector<8x48xf32>
    %c0_17 = arith.constant 0 : index
    %c0_18 = arith.constant 0 : index
    %16 = vector.load %arg5[%c0_17, %c0_18] : memref<32x48xf32, #tpu.memory_space<vmem>>, vector<32x48xf32>
    %cst_19 = arith.constant dense<0.000000e+00> : vector<8x48xf32>
    %17 = tpu.matmul %10, %16, %cst_19 {dimension_numbers = #tpu.dot_dimension_numbers<[1], [0], [0], [1], [0, 0, 1, 1], [], []>} : vector<8x32xf32>, vector<32x48xf32>, vector<8x48xf32> -> vector<8x48xf32>
    %18 = arith.addf %15, %17 : vector<8x48xf32>
    %19 = arith.addf %18, %5 : vector<8x48xf32>
    %c8_i32 = arith.constant 8 : i32
    %20 = arith.muli %9, %c8_i32 : i32
    %21 = arith.index_cast %20 : i32 to index
    %c0_20 = arith.constant 0 : index
    %22 = vector.load %arg11[%21, %c0_20] : memref<64x48xf32, #tpu.memory_space<vmem>>, vector<8x48xf32>
    tpu.vector_store %arg11[%21, %c0_20], %19 {strides = array<i32>} : memref<64x48xf32, #tpu.memory_space<vmem>>, vector<8x48xf32>,
    %23 = vector.extract_strided_slice %19 {offsets = [0, 0], sizes = [8, 32], strides = [1, 1]} : vector<8x48xf32> to vector<8x32xf32>
    %c0_21 = arith.constant 0 : index
    %c0_22 = arith.constant 0 : index
    %24 = vector.load %arg12[%c0_21, %c0_22] : memref<8x32xf32, #tpu.memory_space<vmem>>, vector<8x32xf32>
    tpu.vector_store %arg12[%c0_21, %c0_22], %23 {strides = array<i32>} : memref<8x32xf32, #tpu.memory_space<vmem>>, vector<8x32xf32>,
    %c1_i32_23 = arith.constant 1 : i32
    %c1_i32_24 = arith.constant 1 : i32
    %25 = arith.muli %c1_i32_23, %c1_i32_24 : i32
    %c0_i32_25 = arith.constant 0 : i32
    %26 = arith.addi %c0_i32_25, %25 : i32
    %c0_26 = arith.constant 0 : index
    %c0_27 = arith.constant 0 : index
    %27 = vector.load %arg12[%c0_26, %c0_27] : memref<8x32xf32, #tpu.memory_space<vmem>>, vector<8x32xf32>
    %28 = arith.index_cast %26 : i32 to index
    %c0_28 = arith.constant 0 : index
    %c0_29 = arith.constant 0 : index
    %29 = vector.load %arg0[%28, %c0_28, %c0_29] : memref<8x8x16xf32, #tpu.memory_space<vmem>>, vector<1x8x16xf32>
    %30 = vector.shape_cast %29 : vector<1x8x16xf32> to vector<8x16xf32>
    %c0_30 = arith.constant 0 : index
    %c0_31 = arith.constant 0 : index
    %31 = vector.load %arg4[%c0_30, %c0_31] : memref<16x48xf32, #tpu.memory_space<vmem>>, vector<16x48xf32>
    %cst_32 = arith.constant dense<0.000000e+00> : vector<8x48xf32>
    %32 = tpu.matmul %30, %31, %cst_32 {dimension_numbers = #tpu.dot_dimension_numbers<[1], [0], [0], [1], [0, 0, 1, 1], [], []>} : vector<8x16xf32>, vector<16x48xf32>, vector<8x48xf32> -> vector<8x48xf32>
    %c0_33 = arith.constant 0 : index
    %c0_34 = arith.constant 0 : index
    %33 = vector.load %arg5[%c0_33, %c0_34] : memref<32x48xf32, #tpu.memory_space<vmem>>, vector<32x48xf32>
    %cst_35 = arith.constant dense<0.000000e+00> : vector<8x48xf32>
    %34 = tpu.matmul %27, %33, %cst_35 {dimension_numbers = #tpu.dot_dimension_numbers<[1], [0], [0], [1], [0, 0, 1, 1], [], []>} : vector<8x32xf32>, vector<32x48xf32>, vector<8x48xf32> -> vector<8x48xf32>
    %35 = arith.addf %32, %34 : vector<8x48xf32>
    %36 = arith.addf %35, %5 : vector<8x48xf32>
    %c8_i32_36 = arith.constant 8 : i32
    %37 = arith.muli %26, %c8_i32_36 : i32
    %38 = arith.index_cast %37 : i32 to index
    %c0_37 = arith.constant 0 : index
    %39 = vector.load %arg11[%38, %c0_37] : memref<64x48xf32, #tpu.memory_space<vmem>>, vector<8x48xf32>
    tpu.vector_store %arg11[%38, %c0_37], %36 {strides = array<i32>} : memref<64x48xf32, #tpu.memory_space<vmem>>, vector<8x48xf32>,
    %40 = vector.extract_strided_slice %36 {offsets = [0, 0], sizes = [8, 32], strides = [1, 1]} : vector<8x48xf32> to vector<8x32xf32>
    %c0_38 = arith.constant 0 : index
    %c0_39 = arith.constant 0 : index
    %41 = vector.load %arg12[%c0_38, %c0_39] : memref<8x32xf32, #tpu.memory_space<vmem>>, vector<8x32xf32>
    tpu.vector_store %arg12[%c0_38, %c0_39], %40 {strides = array<i32>} : memref<8x32xf32, #tpu.memory_space<vmem>>, vector<8x32xf32>,
    %c2_i32 = arith.constant 2 : i32
    %c1_i32_40 = arith.constant 1 : i32
    %42 = arith.muli %c2_i32, %c1_i32_40 : i32
    %c0_i32_41 = arith.constant 0 : i32
    %43 = arith.addi %c0_i32_41, %42 : i32
    %c0_42 = arith.constant 0 : index
    %c0_43 = arith.constant 0 : index
    %44 = vector.load %arg12[%c0_42, %c0_43] : memref<8x32xf32, #tpu.memory_space<vmem>>, vector<8x32xf32>
    %45 = arith.index_cast %43 : i32 to index
    %c0_44 = arith.constant 0 : index
    %c0_45 = arith.constant 0 : index
    %46 = vector.load %arg0[%45, %c0_44, %c0_45] : memref<8x8x16xf32, #tpu.memory_space<vmem>>, vector<1x8x16xf32>
    %47 = vector.shape_cast %46 : vector<1x8x16xf32> to vector<8x16xf32>
    %c0_46 = arith.constant 0 : index
    %c0_47 = arith.constant 0 : index
    %48 = vector.load %arg4[%c0_46, %c0_47] : memref<16x48xf32, #tpu.memory_space<vmem>>, vector<16x48xf32>
    %cst_48 = arith.constant dense<0.000000e+00> : vector<8x48xf32>
    %49 = tpu.matmul %47, %48, %cst_48 {dimension_numbers = #tpu.dot_dimension_numbers<[1], [0], [0], [1], [0, 0, 1, 1], [], []>} : vector<8x16xf32>, vector<16x48xf32>, vector<8x48xf32> -> vector<8x48xf32>
    %c0_49 = arith.constant 0 : index
    %c0_50 = arith.constant 0 : index
    %50 = vector.load %arg5[%c0_49, %c0_50] : memref<32x48xf32, #tpu.memory_space<vmem>>, vector<32x48xf32>
    %cst_51 = arith.constant dense<0.000000e+00> : vector<8x48xf32>
    %51 = tpu.matmul %44, %50, %cst_51 {dimension_numbers = #tpu.dot_dimension_numbers<[1], [0], [0], [1], [0, 0, 1, 1], [], []>} : vector<8x32xf32>, vector<32x48xf32>, vector<8x48xf32> -> vector<8x48xf32>
    %52 = arith.addf %49, %51 : vector<8x48xf32>
    %53 = arith.addf %52, %5 : vector<8x48xf32>
    %c8_i32_52 = arith.constant 8 : i32
    %54 = arith.muli %43, %c8_i32_52 : i32
    %55 = arith.index_cast %54 : i32 to index
    %c0_53 = arith.constant 0 : index
    %56 = vector.load %arg11[%55, %c0_53] : memref<64x48xf32, #tpu.memory_space<vmem>>, vector<8x48xf32>
    tpu.vector_store %arg11[%55, %c0_53], %53 {strides = array<i32>} : memref<64x48xf32, #tpu.memory_space<vmem>>, vector<8x48xf32>,
    %57 = vector.extract_strided_slice %53 {offsets = [0, 0], sizes = [8, 32], strides = [1, 1]} : vector<8x48xf32> to vector<8x32xf32>
    %c0_54 = arith.constant 0 : index
    %c0_55 = arith.constant 0 : index
    %58 = vector.load %arg12[%c0_54, %c0_55] : memref<8x32xf32, #tpu.memory_space<vmem>>, vector<8x32xf32>
    tpu.vector_store %arg12[%c0_54, %c0_55], %57 {strides = array<i32>} : memref<8x32xf32, #tpu.memory_space<vmem>>, vector<8x32xf32>,
    %c3_i32 = arith.constant 3 : i32
    %c1_i32_56 = arith.constant 1 : i32
    %59 = arith.muli %c3_i32, %c1_i32_56 : i32
    %c0_i32_57 = arith.constant 0 : i32
    %60 = arith.addi %c0_i32_57, %59 : i32
    %c0_58 = arith.constant 0 : index
    %c0_59 = arith.constant 0 : index
    %61 = vector.load %arg12[%c0_58, %c0_59] : memref<8x32xf32, #tpu.memory_space<vmem>>, vector<8x32xf32>
    %62 = arith.index_cast %60 : i32 to index
    %c0_60 = arith.constant 0 : index
    %c0_61 = arith.constant 0 : index
    %63 = vector.load %arg0[%62, %c0_60, %c0_61] : memref<8x8x16xf32, #tpu.memory_space<vmem>>, vector<1x8x16xf32>
    %64 = vector.shape_cast %63 : vector<1x8x16xf32> to vector<8x16xf32>
    %c0_62 = arith.constant 0 : index
    %c0_63 = arith.constant 0 : index
    %65 = vector.load %arg4[%c0_62, %c0_63] : memref<16x48xf32, #tpu.memory_space<vmem>>, vector<16x48xf32>
    %cst_64 = arith.constant dense<0.000000e+00> : vector<8x48xf32>
    %66 = tpu.matmul %64, %65, %cst_64 {dimension_numbers = #tpu.dot_dimension_numbers<[1], [0], [0], [1], [0, 0, 1, 1], [], []>} : vector<8x16xf32>, vector<16x48xf32>, vector<8x48xf32> -> vector<8x48xf32>
    %c0_65 = arith.constant 0 : index
    %c0_66 = arith.constant 0 : index
    %67 = vector.load %arg5[%c0_65, %c0_66] : memref<32x48xf32, #tpu.memory_space<vmem>>, vector<32x48xf32>
    %cst_67 = arith.constant dense<0.000000e+00> : vector<8x48xf32>
    %68 = tpu.matmul %61, %67, %cst_67 {dimension_numbers = #tpu.dot_dimension_numbers<[1], [0], [0], [1], [0, 0, 1, 1], [], []>} : vector<8x32xf32>, vector<32x48xf32>, vector<8x48xf32> -> vector<8x48xf32>
    %69 = arith.addf %66, %68 : vector<8x48xf32>
    %70 = arith.addf %69, %5 : vector<8x48xf32>
    %c8_i32_68 = arith.constant 8 : i32
    %71 = arith.muli %60, %c8_i32_68 : i32
    %72 = arith.index_cast %71 : i32 to index
    %c0_69 = arith.constant 0 : index
    %73 = vector.load %arg11[%72, %c0_69] : memref<64x48xf32, #tpu.memory_space<vmem>>, vector<8x48xf32>
    tpu.vector_store %arg11[%72, %c0_69], %70 {strides = array<i32>} : memref<64x48xf32, #tpu.memory_space<vmem>>, vector<8x48xf32>,
    %74 = vector.extract_strided_slice %70 {offsets = [0, 0], sizes = [8, 32], strides = [1, 1]} : vector<8x48xf32> to vector<8x32xf32>
    %c0_70 = arith.constant 0 : index
    %c0_71 = arith.constant 0 : index
    %75 = vector.load %arg12[%c0_70, %c0_71] : memref<8x32xf32, #tpu.memory_space<vmem>>, vector<8x32xf32>
    tpu.vector_store %arg12[%c0_70, %c0_71], %74 {strides = array<i32>} : memref<8x32xf32, #tpu.memory_space<vmem>>, vector<8x32xf32>,
    %c4_i32 = arith.constant 4 : i32
    %c1_i32_72 = arith.constant 1 : i32
    %76 = arith.muli %c4_i32, %c1_i32_72 : i32
    %c0_i32_73 = arith.constant 0 : i32
    %77 = arith.addi %c0_i32_73, %76 : i32
    %c0_74 = arith.constant 0 : index
    %c0_75 = arith.constant 0 : index
    %78 = vector.load %arg12[%c0_74, %c0_75] : memref<8x32xf32, #tpu.memory_space<vmem>>, vector<8x32xf32>
    %79 = arith.index_cast %77 : i32 to index
    %c0_76 = arith.constant 0 : index
    %c0_77 = arith.constant 0 : index
    %80 = vector.load %arg0[%79, %c0_76, %c0_77] : memref<8x8x16xf32, #tpu.memory_space<vmem>>, vector<1x8x16xf32>
    %81 = vector.shape_cast %80 : vector<1x8x16xf32> to vector<8x16xf32>
    %c0_78 = arith.constant 0 : index
    %c0_79 = arith.constant 0 : index
    %82 = vector.load %arg4[%c0_78, %c0_79] : memref<16x48xf32, #tpu.memory_space<vmem>>, vector<16x48xf32>
    %cst_80 = arith.constant dense<0.000000e+00> : vector<8x48xf32>
    %83 = tpu.matmul %81, %82, %cst_80 {dimension_numbers = #tpu.dot_dimension_numbers<[1], [0], [0], [1], [0, 0, 1, 1], [], []>} : vector<8x16xf32>, vector<16x48xf32>, vector<8x48xf32> -> vector<8x48xf32>
    %c0_81 = arith.constant 0 : index
    %c0_82 = arith.constant 0 : index
    %84 = vector.load %arg5[%c0_81, %c0_82] : memref<32x48xf32, #tpu.memory_space<vmem>>, vector<32x48xf32>
    %cst_83 = arith.constant dense<0.000000e+00> : vector<8x48xf32>
    %85 = tpu.matmul %78, %84, %cst_83 {dimension_numbers = #tpu.dot_dimension_numbers<[1], [0], [0], [1], [0, 0, 1, 1], [], []>} : vector<8x32xf32>, vector<32x48xf32>, vector<8x48xf32> -> vector<8x48xf32>
    %86 = arith.addf %83, %85 : vector<8x48xf32>
    %87 = arith.addf %86, %5 : vector<8x48xf32>
    %c8_i32_84 = arith.constant 8 : i32
    %88 = arith.muli %77, %c8_i32_84 : i32
    %89 = arith.index_cast %88 : i32 to index
    %c0_85 = arith.constant 0 : index
    %90 = vector.load %arg11[%89, %c0_85] : memref<64x48xf32, #tpu.memory_space<vmem>>, vector<8x48xf32>
    tpu.vector_store %arg11[%89, %c0_85], %87 {strides = array<i32>} : memref<64x48xf32, #tpu.memory_space<vmem>>, vector<8x48xf32>,
    %91 = vector.extract_strided_slice %87 {offsets = [0, 0], sizes = [8, 32], strides = [1, 1]} : vector<8x48xf32> to vector<8x32xf32>
    %c0_86 = arith.constant 0 : index
    %c0_87 = arith.constant 0 : index
    %92 = vector.load %arg12[%c0_86, %c0_87] : memref<8x32xf32, #tpu.memory_space<vmem>>, vector<8x32xf32>
    tpu.vector_store %arg12[%c0_86, %c0_87], %91 {strides = array<i32>} : memref<8x32xf32, #tpu.memory_space<vmem>>, vector<8x32xf32>,
    %c5_i32 = arith.constant 5 : i32
    %c1_i32_88 = arith.constant 1 : i32
    %93 = arith.muli %c5_i32, %c1_i32_88 : i32
    %c0_i32_89 = arith.constant 0 : i32
    %94 = arith.addi %c0_i32_89, %93 : i32
    %c0_90 = arith.constant 0 : index
    %c0_91 = arith.constant 0 : index
    %95 = vector.load %arg12[%c0_90, %c0_91] : memref<8x32xf32, #tpu.memory_space<vmem>>, vector<8x32xf32>
    %96 = arith.index_cast %94 : i32 to index
    %c0_92 = arith.constant 0 : index
    %c0_93 = arith.constant 0 : index
    %97 = vector.load %arg0[%96, %c0_92, %c0_93] : memref<8x8x16xf32, #tpu.memory_space<vmem>>, vector<1x8x16xf32>
    %98 = vector.shape_cast %97 : vector<1x8x16xf32> to vector<8x16xf32>
    %c0_94 = arith.constant 0 : index
    %c0_95 = arith.constant 0 : index
    %99 = vector.load %arg4[%c0_94, %c0_95] : memref<16x48xf32, #tpu.memory_space<vmem>>, vector<16x48xf32>
    %cst_96 = arith.constant dense<0.000000e+00> : vector<8x48xf32>
    %100 = tpu.matmul %98, %99, %cst_96 {dimension_numbers = #tpu.dot_dimension_numbers<[1], [0], [0], [1], [0, 0, 1, 1], [], []>} : vector<8x16xf32>, vector<16x48xf32>, vector<8x48xf32> -> vector<8x48xf32>
    %c0_97 = arith.constant 0 : index
    %c0_98 = arith.constant 0 : index
    %101 = vector.load %arg5[%c0_97, %c0_98] : memref<32x48xf32, #tpu.memory_space<vmem>>, vector<32x48xf32>
    %cst_99 = arith.constant dense<0.000000e+00> : vector<8x48xf32>
    %102 = tpu.matmul %95, %101, %cst_99 {dimension_numbers = #tpu.dot_dimension_numbers<[1], [0], [0], [1], [0, 0, 1, 1], [], []>} : vector<8x32xf32>, vector<32x48xf32>, vector<8x48xf32> -> vector<8x48xf32>
    %103 = arith.addf %100, %102 : vector<8x48xf32>
    %104 = arith.addf %103, %5 : vector<8x48xf32>
    %c8_i32_100 = arith.constant 8 : i32
    %105 = arith.muli %94, %c8_i32_100 : i32
    %106 = arith.index_cast %105 : i32 to index
    %c0_101 = arith.constant 0 : index
    %107 = vector.load %arg11[%106, %c0_101] : memref<64x48xf32, #tpu.memory_space<vmem>>, vector<8x48xf32>
    tpu.vector_store %arg11[%106, %c0_101], %104 {strides = array<i32>} : memref<64x48xf32, #tpu.memory_space<vmem>>, vector<8x48xf32>,
    %108 = vector.extract_strided_slice %104 {offsets = [0, 0], sizes = [8, 32], strides = [1, 1]} : vector<8x48xf32> to vector<8x32xf32>
    %c0_102 = arith.constant 0 : index
    %c0_103 = arith.constant 0 : index
    %109 = vector.load %arg12[%c0_102, %c0_103] : memref<8x32xf32, #tpu.memory_space<vmem>>, vector<8x32xf32>
    tpu.vector_store %arg12[%c0_102, %c0_103], %108 {strides = array<i32>} : memref<8x32xf32, #tpu.memory_space<vmem>>, vector<8x32xf32>,
    %c6_i32 = arith.constant 6 : i32
    %c1_i32_104 = arith.constant 1 : i32
    %110 = arith.muli %c6_i32, %c1_i32_104 : i32
    %c0_i32_105 = arith.constant 0 : i32
    %111 = arith.addi %c0_i32_105, %110 : i32
    %c0_106 = arith.constant 0 : index
    %c0_107 = arith.constant 0 : index
    %112 = vector.load %arg12[%c0_106, %c0_107] : memref<8x32xf32, #tpu.memory_space<vmem>>, vector<8x32xf32>
    %113 = arith.index_cast %111 : i32 to index
    %c0_108 = arith.constant 0 : index
    %c0_109 = arith.constant 0 : index
    %114 = vector.load %arg0[%113, %c0_108, %c0_109] : memref<8x8x16xf32, #tpu.memory_space<vmem>>, vector<1x8x16xf32>
    %115 = vector.shape_cast %114 : vector<1x8x16xf32> to vector<8x16xf32>
    %c0_110 = arith.constant 0 : index
    %c0_111 = arith.constant 0 : index
    %116 = vector.load %arg4[%c0_110, %c0_111] : memref<16x48xf32, #tpu.memory_space<vmem>>, vector<16x48xf32>
    %cst_112 = arith.constant dense<0.000000e+00> : vector<8x48xf32>
    %117 = tpu.matmul %115, %116, %cst_112 {dimension_numbers = #tpu.dot_dimension_numbers<[1], [0], [0], [1], [0, 0, 1, 1], [], []>} : vector<8x16xf32>, vector<16x48xf32>, vector<8x48xf32> -> vector<8x48xf32>
    %c0_113 = arith.constant 0 : index
    %c0_114 = arith.constant 0 : index
    %118 = vector.load %arg5[%c0_113, %c0_114] : memref<32x48xf32, #tpu.memory_space<vmem>>, vector<32x48xf32>
    %cst_115 = arith.constant dense<0.000000e+00> : vector<8x48xf32>
    %119 = tpu.matmul %112, %118, %cst_115 {dimension_numbers = #tpu.dot_dimension_numbers<[1], [0], [0], [1], [0, 0, 1, 1], [], []>} : vector<8x32xf32>, vector<32x48xf32>, vector<8x48xf32> -> vector<8x48xf32>
    %120 = arith.addf %117, %119 : vector<8x48xf32>
    %121 = arith.addf %120, %5 : vector<8x48xf32>
    %c8_i32_116 = arith.constant 8 : i32
    %122 = arith.muli %111, %c8_i32_116 : i32
    %123 = arith.index_cast %122 : i32 to index
    %c0_117 = arith.constant 0 : index
    %124 = vector.load %arg11[%123, %c0_117] : memref<64x48xf32, #tpu.memory_space<vmem>>, vector<8x48xf32>
    tpu.vector_store %arg11[%123, %c0_117], %121 {strides = array<i32>} : memref<64x48xf32, #tpu.memory_space<vmem>>, vector<8x48xf32>,
    %125 = vector.extract_strided_slice %121 {offsets = [0, 0], sizes = [8, 32], strides = [1, 1]} : vector<8x48xf32> to vector<8x32xf32>
    %c0_118 = arith.constant 0 : index
    %c0_119 = arith.constant 0 : index
    %126 = vector.load %arg12[%c0_118, %c0_119] : memref<8x32xf32, #tpu.memory_space<vmem>>, vector<8x32xf32>
    tpu.vector_store %arg12[%c0_118, %c0_119], %125 {strides = array<i32>} : memref<8x32xf32, #tpu.memory_space<vmem>>, vector<8x32xf32>,
    %c7_i32 = arith.constant 7 : i32
    %c1_i32_120 = arith.constant 1 : i32
    %127 = arith.muli %c7_i32, %c1_i32_120 : i32
    %c0_i32_121 = arith.constant 0 : i32
    %128 = arith.addi %c0_i32_121, %127 : i32
    %c0_122 = arith.constant 0 : index
    %c0_123 = arith.constant 0 : index
    %129 = vector.load %arg12[%c0_122, %c0_123] : memref<8x32xf32, #tpu.memory_space<vmem>>, vector<8x32xf32>
    %130 = arith.index_cast %128 : i32 to index
    %c0_124 = arith.constant 0 : index
    %c0_125 = arith.constant 0 : index
    %131 = vector.load %arg0[%130, %c0_124, %c0_125] : memref<8x8x16xf32, #tpu.memory_space<vmem>>, vector<1x8x16xf32>
    %132 = vector.shape_cast %131 : vector<1x8x16xf32> to vector<8x16xf32>
    %c0_126 = arith.constant 0 : index
    %c0_127 = arith.constant 0 : index
    %133 = vector.load %arg4[%c0_126, %c0_127] : memref<16x48xf32, #tpu.memory_space<vmem>>, vector<16x48xf32>
    %cst_128 = arith.constant dense<0.000000e+00> : vector<8x48xf32>
    %134 = tpu.matmul %132, %133, %cst_128 {dimension_numbers = #tpu.dot_dimension_numbers<[1], [0], [0], [1], [0, 0, 1, 1], [], []>} : vector<8x16xf32>, vector<16x48xf32>, vector<8x48xf32> -> vector<8x48xf32>
    %c0_129 = arith.constant 0 : index
    %c0_130 = arith.constant 0 : index
    %135 = vector.load %arg5[%c0_129, %c0_130] : memref<32x48xf32, #tpu.memory_space<vmem>>, vector<32x48xf32>
    %cst_131 = arith.constant dense<0.000000e+00> : vector<8x48xf32>
    %136 = tpu.matmul %129, %135, %cst_131 {dimension_numbers = #tpu.dot_dimension_numbers<[1], [0], [0], [1], [0, 0, 1, 1], [], []>} : vector<8x32xf32>, vector<32x48xf32>, vector<8x48xf32> -> vector<8x48xf32>
    %137 = arith.addf %134, %136 : vector<8x48xf32>
    %138 = arith.addf %137, %5 : vector<8x48xf32>
    %c8_i32_132 = arith.constant 8 : i32
    %139 = arith.muli %128, %c8_i32_132 : i32
    %140 = arith.index_cast %139 : i32 to index
    %c0_133 = arith.constant 0 : index
    %141 = vector.load %arg11[%140, %c0_133] : memref<64x48xf32, #tpu.memory_space<vmem>>, vector<8x48xf32>
    tpu.vector_store %arg11[%140, %c0_133], %138 {strides = array<i32>} : memref<64x48xf32, #tpu.memory_space<vmem>>, vector<8x48xf32>,
    %142 = vector.extract_strided_slice %138 {offsets = [0, 0], sizes = [8, 32], strides = [1, 1]} : vector<8x48xf32> to vector<8x32xf32>
    %c0_134 = arith.constant 0 : index
    %c0_135 = arith.constant 0 : index
    %143 = vector.load %arg12[%c0_134, %c0_135] : memref<8x32xf32, #tpu.memory_space<vmem>>, vector<8x32xf32>
    tpu.vector_store %arg12[%c0_134, %c0_135], %142 {strides = array<i32>} : memref<8x32xf32, #tpu.memory_space<vmem>>, vector<8x32xf32>,
    %c8_i32_136 = arith.constant 8 : i32
    %c0_137 = arith.constant 0 : index
    %c0_138 = arith.constant 0 : index
    %144 = vector.load %arg12[%c0_137, %c0_138] : memref<8x32xf32, #tpu.memory_space<vmem>>, vector<8x32xf32>
    %c0_139 = arith.constant 0 : index
    %c0_140 = arith.constant 0 : index
    %145 = vector.load %arg10[%c0_139, %c0_140] : memref<8x32xf32, #tpu.memory_space<vmem>>, vector<8x32xf32>
    tpu.vector_store %arg10[%c0_139, %c0_140], %144 {strides = array<i32>} : memref<8x32xf32, #tpu.memory_space<vmem>>, vector<8x32xf32>,
    %c0_141 = arith.constant 0 : index
    %c0_142 = arith.constant 0 : index
    %146 = vector.load %arg11[%c0_141, %c0_142] : memref<64x48xf32, #tpu.memory_space<vmem>>, vector<64x48xf32>
    %c0_143 = arith.constant 0 : index
    %c0_144 = arith.constant 0 : index
    %147 = vector.load %arg7[%c0_143, %c0_144] : memref<48x16xf32, #tpu.memory_space<vmem>>, vector<48x16xf32>
    %cst_145 = arith.constant dense<0.000000e+00> : vector<64x16xf32>
    %148 = tpu.matmul %146, %147, %cst_145 {dimension_numbers = #tpu.dot_dimension_numbers<[1], [0], [0], [1], [0, 0, 1, 1], [], []>} : vector<64x48xf32>, vector<48x16xf32>, vector<64x16xf32> -> vector<64x16xf32>
    %c0_146 = arith.constant 0 : index
    %c0_147 = arith.constant 0 : index
    %149 = vector.load %arg8[%c0_146, %c0_147] : memref<1x16xf32, #tpu.memory_space<vmem>>, vector<1x16xf32>
    %150 = vector.broadcast %149 : vector<1x16xf32> to vector<64x16xf32>
    %151 = arith.addf %148, %150 : vector<64x16xf32>
    %cst_148 = arith.constant dense<0xFF800000> : vector<64xf32>
    %152 = vector.multi_reduction <maximumf>, %151, %cst_148 [1] : vector<64x16xf32> to vector<64xf32>
    %153 = vector.shape_cast %152 : vector<64xf32> to vector<64x1xf32>
    %154 = vector.broadcast %153 : vector<64x1xf32> to vector<64x16xf32>
    %155 = arith.subf %151, %154 : vector<64x16xf32>
    %156 = math.exp %155 : vector<64x16xf32>
    %cst_149 = arith.constant dense<0.000000e+00> : vector<64xf32>
    %157 = vector.multi_reduction <add>, %156, %cst_149 [1] : vector<64x16xf32> to vector<64xf32>
    %158 = vector.shape_cast %157 : vector<64xf32> to vector<64x1xf32>
    %159 = math.log %158 : vector<64x1xf32>
    %160 = vector.broadcast %159 : vector<64x1xf32> to vector<64x16xf32>
    %161 = arith.subf %155, %160 : vector<64x16xf32>
    %c0_150 = arith.constant 0 : index
    %c0_151 = arith.constant 0 : index
    %162 = vector.load %arg9[%c0_150, %c0_151] : memref<64x16xf32, #tpu.memory_space<vmem>>, vector<64x16xf32>
    tpu.vector_store %arg9[%c0_150, %c0_151], %161 {strides = array<i32>} : memref<64x16xf32, #tpu.memory_space<vmem>>, vector<64x16xf32>,
    return
  }
}

</mosaic_0001>

<bundles_post_ra>
// kernel: tpu_custom_call.1
= control target key start
LH: loop header
LB: loop body
LE: loop exit
PB: predicated region body
PF: predicated region fallthrough
CT: control target
= control target key end

     0   :  { %16 = vsyncpa [#allocation5], 0  ;;  %s2594_s0 = inlined_call_operand.vmem [shape: f32[8,8,16], index: 0, kind: input, shape index: {}]   ;;  %s2595_s1 = inlined_call_operand.hbm [shape: f32[8,8], index: 1, kind: input, shape index: {}]   ;;  %s2596_s2 = inlined_call_operand.hbm [shape: f32[8,32], index: 2, kind: input, shape index: {}]   ;;  %s2597_s3 = inlined_call_operand.hbm [shape: f32[8,48], index: 3, kind: input, shape index: {}]   ;;  %s2598_s4 = inlined_call_operand.hbm [shape: f32[16,48], index: 4, kind: input, shape index: {}]   ;;  %s2599_s5 = inlined_call_operand.hbm [shape: f32[32,48], index: 5, kind: input, shape index: {}]   ;;  %s2600_s6 = inlined_call_operand.vmem [shape: f32[1,48], index: 6, kind: input, shape index: {}]   ;;  %s2601_s7 = inlined_call_operand.vmem [shape: f32[48,16], index: 7, kind: input, shape index: {}]   ;;  %s2602_s8 = inlined_call_operand.vmem [shape: f32[1,16], index: 8, kind: input, shape index: {}]   ;;  %s2603_s9 = inlined_call_operand.vmem [shape: f32[64,16], index: 9, kind: output, shape index: {0}]   ;;  %s2604_s10 = inlined_call_operand.hbm [shape: f32[8,32], index: 10, kind: output, shape index: {1}]  }
   0x1   :  { %17 = vsyncpa [#allocation8], 0 }
   0x2   :  { %18 = vsyncpa [#allocation11], 0 }
   0x3   :  { %19 = vsyncpa [#allocation6], 0  ;;  %s2182_s13 = smov [#allocation7]   ;;  %s2183_s15 = smov [#allocation10]  }
   0x4   :  { %s38_s14 = sshll.u32 %s2182_s13, 4  ;;  %s57_s16 = sshll.u32 %s2183_s15, 4  ;;  %s39_s14 = int_to_ptr.vmem [resolvable:$true] %s38_s14  ;;  %s58_s16 = int_to_ptr.vmem [resolvable:$true] %s57_s16 }
   0x5   :  { %s2062_s17 = scalar_lea.vmem %s39_s14, 128  ;;  %p2067_p1 = scmp.lt.s32.totalorder %s39_s14, %s39_s14 }
   0x6   :  { %p2063_p0 = scmp.ne.s32.totalorder %s39_s14, %s2062_s17  ;;  %p2068_p2 = scmp.lt.s32.totalorder %s2062_s17, %s2062_s17 }
   0x8   :  { %p2069_p3 = por %p2068_p2, %p2067_p1 }
   0xa   :  { %p2070_p4 = pnand %p2069_p3, %p2063_p0 }
   0xc   :  { %2073 = shalt.err (!%p2070_p4)
}
   0xd   :  { %41 = dma.hbm_to_vmem [thread:$0]  %s2596_s2, 128, %s39_s14, [#allocation8]  }
   0xe   :  { %s2082_s20 = scalar_lea.vmem %s58_s16, 256  ;;  %p2087_p6 = scmp.lt.s32.totalorder %s58_s16, %s58_s16 }
   0xf   :  { %p2083_p5 = scmp.ne.s32.totalorder %s58_s16, %s2082_s20  ;;  %p2088_p7 = scmp.lt.s32.totalorder %s2082_s20, %s2082_s20 }
  0x11   :  { %p2089_p8 = por %p2088_p7, %p2087_p6 }
  0x13   :  { %p2090_p9 = pnand %p2089_p8, %p2083_p5 }
  0x15   :  { %2093 = shalt.err (!%p2090_p9)
}
  0x16   :  { %s2184_s21 = smov 128   ;;  %s2185_s22 = smov 8  }
  0x17   :  { %63 = dma.hbm_to_vmem [thread:$0]  %s2598_s4, 256, %s58_s16, [#allocation11], %s2184_s21, %s2184_s21, %s2185_s22  }
  0x18   :  { %s2186_s25 = smov [#allocation4]   ;;  %s2187_s27 = smov [#allocation9]  }
  0x19   :  { %s28_s26 = sshll.u32 %s2186_s25, 4  ;;  %s48_s2 = sshll.u32 %s2187_s27, 4  ;;  %s29_s26 = int_to_ptr.vmem [resolvable:$true] %s28_s26  ;;  %s49_s2 = int_to_ptr.vmem [resolvable:$true] %s48_s2 }
  0x1a   :  { %s2102_s28 = scalar_lea.vmem %s29_s26, 128  ;;  %p2107_p11 = scmp.lt.s32.totalorder %s29_s26, %s29_s26 }
  0x1b   :  { %p2103_p10 = scmp.ne.s32.totalorder %s29_s26, %s2102_s28  ;;  %p2108_p12 = scmp.lt.s32.totalorder %s2102_s28, %s2102_s28 }
  0x1d   :  { %p2109_p13 = por %p2108_p12, %p2107_p11 }
  0x1f   :  { %p2110_p0 = pnand %p2109_p13, %p2103_p10 }
  0x21   :  { %2113 = shalt.err (!%p2110_p0)
}
  0x22   :  { %31 = dma.hbm_to_vmem [thread:$0]  %s2595_s1, 128, %s29_s26, [#allocation5]  }
  0x23   :  { %s2122_s11 = scalar_lea.vmem %s49_s2, 128  ;;  %p2127_p2 = scmp.lt.s32.totalorder %s49_s2, %s49_s2 }
  0x24   :  { %p2123_p1 = scmp.ne.s32.totalorder %s49_s2, %s2122_s11  ;;  %p2128_p3 = scmp.lt.s32.totalorder %s2122_s11, %s2122_s11 }
  0x26   :  { %p2129_p4 = por %p2128_p3, %p2127_p2 }
  0x28   :  { %p2130_p5 = pnand %p2129_p4, %p2123_p1 }
  0x2a   :  { %2133 = shalt.err (!%p2130_p5)
}
  0x2b   :  { %51 = dma.hbm_to_vmem [thread:$0]  %s2597_s3, 128, %s49_s2, [#allocation8]  }
  0x2c   :  { %s2188_s13 = smov [#allocation12]  }
  0x2d   :  { %s69_s14 = sshll.u32 %s2188_s13, 4  ;;  %s70_s14 = int_to_ptr.vmem [resolvable:$true] %s69_s14 }
  0x2e   :  { %s2142_s15 = scalar_lea.vmem %s70_s14, 512  ;;  %p2147_p7 = scmp.lt.s32.totalorder %s70_s14, %s70_s14 }
  0x2f   :  { %p2143_p6 = scmp.ne.s32.totalorder %s70_s14, %s2142_s15  ;;  %p2148_p8 = scmp.lt.s32.totalorder %s2142_s15, %s2142_s15 }
  0x31   :  { %p2149_p9 = por %p2148_p8, %p2147_p7 }
  0x33   :  { %p2150_p10 = pnand %p2149_p9, %p2143_p6 }
  0x35   :  { %2153 = shalt.err (!%p2150_p10)
}
  0x36   :  { %75 = dma.hbm_to_vmem [thread:$0]  %s2599_s5, 512, %s70_s14, [#allocation11], %s2184_s21, %s2184_s21, %s2185_s22  }
  0x37   :  { %2174 = dma.done.wait [#allocation5], 128  }
  0x38   :  { %2175 = vsyncadd [#allocation5], 4294967168 }
  0x39   :  { %2176 = dma.done.wait [#allocation8], 256  }
  0x3a   :  { %2177 = vsyncadd [#allocation8], 4294967040 }
  0x3b   :  { %2178 = dma.done.wait [#allocation11], 768  }
  0x3c   :  { %2179 = vsyncadd [#allocation11], 4294966528  ;;  %v2189_v0 = vmov 0.0   ;;  %vm2190_vm0 = vmmov 0   ;;  %vm106_vm1 = vcmask 64512   ;;  %v98_v1 = vld [vmem:[#allocation9] sm:$0xff] }
  0x3d   :  { %1839 = vmatprep.subr.mxu0 %v2189_v0  ;;  %1841 = vmatprep.mubr.msk.f32.mxu0 %vm2190_vm0, %v2189_v0  ;;  %v97_v2 = vld [vmem:[#allocation4] sm:$0xff]  ;;  %vm181_vm2 = vcmask 261120   ;;  %v2278_v4 = vld [vmem:[#allocation12 + $0x10] sm:$0xff]  ;;  %v180_v5 = vld [vmem:[#allocation7] sm:$0xff]  ;;  %vm264_vm3 = vcmask 130048   ;;  %vm339_vm4 = vcmask 392192  }
  0x3e   :  { %1880 = vmatprep.subr.mxu1 %v2189_v0  ;;  %1888 = vmatprep.mubr.msk.f32.mxu1 %vm2190_vm0, %v2189_v0  ;;  %v2274_v3 = vld [vmem:[#allocation12 + $0x18] sm:$0xff]  ;;  %182 = vst.msk [vmem:[#allocation3] sm:$0xff] %vm181_vm2, %v180_v5  ;;  %v2285_v6 = vld [vmem:[#allocation12 + $0x8] sm:$0xff]  ;;  %v2291_v7 = vld [vmem:[#allocation12] sm:$0xff]  ;;  %s2191_s28 = smov [#allocation13]  }
  0x3f   :  { %1840 = vmatpush3.msra.mxu0 %v98_v1  ;;  %1881 = vmatpush3.msra.mxu1 %v2274_v3  ;;  %v2299_v8 = vld [vmem:[#allocation10 + $0x8] sm:$0xff]  ;;  %v2305_v10 = vld [vmem:[#allocation10] sm:$0xff]  ;;  %v1732_v24 = vld [vmem:[%s2594_s0 + $0x10] sm:$0xff]  ;;  %s1712_s29 = sshll.u32 %s2191_s28, 4  ;;  %s1713_s29 = int_to_ptr.vmem [resolvable:$true] %s1712_s29 }
  0x40   :  { %1842 = vmatmul.mubr.msk.f32.vlgmr.msra.gmra.mxu0 %vm106_vm1, %v97_v2  ;;  %1844 = vmatprep.subr.mxu0 %v2189_v0  ;;  %v184_v11 = vld [vmem:[%s2594_s0] sm:$0xff]  ;;  %v1729_v23 = vld [vmem:[%s2594_s0 + $0x8] sm:$0xff]  ;;  %v1735_v34 = vld [vmem:[%s2594_s0 + $0x18] sm:$0xff]  ;;  %s2154_s30 = scalar_lea.vmem %s1713_s29, 128  ;;  %p2159_p12 = scmp.lt.s32.totalorder %s1713_s29, %s1713_s29 }
  0x41   :  { %1845 = vmatpush3.msra.mxu0 %v2274_v3  ;;  %1852 = vmatprep.mubr.msk.f32.mxu0 %vm2190_vm0, %v2189_v0  ;;  %v1725_v15 = vld [vmem:[%s2600_s6] ss:$0 sm:$0xff]  ;;  %v1741_v50 = vld [vmem:[%s2594_s0 + $0x28] sm:$0xff]  ;;  %v1744_v58 = vld [vmem:[%s2594_s0 + $0x30] sm:$0xff]  ;;  %p2155_p11 = scmp.ne.s32.totalorder %s1713_s29, %s2154_s30  ;;  %p2160_p13 = scmp.lt.s32.totalorder %s2154_s30, %s2154_s30 }
  0x42   :  { %1846 = vmatprep.subr.mxu0 %v2189_v0  ;;  %1882 = vmatprep.subr.mxu1 %v2189_v0  ;;  %v1738_v42 = vld [vmem:[%s2594_s0 + $0x20] sm:$0xff]  ;;  %v1463_v1 = vld [vmem:[%s2601_s7 + $0x28] sm:$0xff]  ;;  %v1747_v2 = vld [vmem:[%s2594_s0 + $0x38] sm:$0xff] }
  0x43   :  { %1847 = vmatpush3.msra.mxu0 %v2278_v4  ;;  %1883 = vmatpush3.msra.mxu1 %v2278_v4  ;;  %v1461_v5 = vld [vmem:[%s2601_s7 + $0x18] sm:$0xff]  ;;  %p2161_p0 = por %p2160_p13, %p2159_p12 }
  0x44   :  { %1848 = vmatprep.subr.mxu0 %v2189_v0  ;;  %1884 = vmatprep.subr.mxu1 %v2189_v0 }
  0x45   :  { %1849 = vmatpush3.msra.mxu0 %v2285_v6  ;;  %1885 = vmatpush3.msra.mxu1 %v2285_v6  ;;  %v183_v9 = vld [vmem:[#allocation3] sm:$0xff]  ;;  %p2162_p1 = pnand %p2161_p0, %p2155_p11 }
  0x46   :  { %1850 = vmatprep.subr.mxu0 %v2189_v0  ;;  %1886 = vmatprep.subr.mxu1 %v2189_v0 }
  0x47   :  { %1851 = vmatpush3.msra.mxu0 %v2291_v7  ;;  %1887 = vmatpush3.msra.mxu1 %v2291_v7 }
  0x48   :  { %1855 = vmatprep.subr.mxu0 %v2189_v0  ;;  %1909 = vmatprep.subr.mxu1 %v2189_v0 }
  0x49   :  { %1853 = vmatmul.mubr.msk.f32.vlgmr.msra.gmra.mxu0 %vm181_vm2, %v183_v9 }
  0x4a   :  { %1856 = vmatpush3.msra.mxu0 %v2299_v8  ;;  %1859 = vmatprep.mubr.msk.f32.mxu0 %vm2190_vm0, %v2189_v0 }
  0x4b   :  { %1857 = vmatprep.subr.mxu0 %v2189_v0 }
  0x4c   :  { %1858 = vmatpush3.msra.mxu0 %v2305_v10 }
  0x4d   :  { %1860 = vmatmul.mubr.msk.f32.vlgmr.msra.gmra.mxu0 %vm264_vm3, %v184_v11  ;;  %1862 = vmatprep.subr.mxu0 %v2189_v0 }
  0x4e   :  { %1863 = vmatpush3.msra.mxu0 %v2274_v3  ;;  %1870 = vmatprep.mubr.msk.f32.mxu0 %vm2190_vm0, %v2189_v0 }
  0x4f   :  { %1864 = vmatprep.subr.mxu0 %v2189_v0 }
  0x50   :  { %1865 = vmatpush3.msra.mxu0 %v2278_v4 }
  0x51   :  { %1866 = vmatprep.subr.mxu0 %v2189_v0 }
  0x52   :  { %1867 = vmatpush3.msra.mxu0 %v2285_v6 }
  0x53   :  { %1868 = vmatprep.subr.mxu0 %v2189_v0 }
  0x54   :  { %1869 = vmatpush3.msra.mxu0 %v2291_v7 }
  0x55   :  { %1873 = vmatprep.subr.mxu0 %v2189_v0 }
 0x100   :  { %v176_v12 = vpop.f32.mrf.mxu0 }
 0x101   :  { %v2330_v18 = vadd.f32 %v1725_v15, %v176_v12 }
 0x102   :  { %v1843_v13 = vpop.f32.mrf.mxu0 }
 0x109   :  { %v260_v14 = vpop.f32.mrf.mxu0 }
 0x10b   :  { %v1854_v16 = vpop.f32.mrf.mxu0 }
 0x10d   :  { %v334_v17 = vpop.f32.mrf.mxu0 }
 0x10e   :  { %v335_v19 = vadd.f32 %v334_v17, %v260_v14 }
 0x10f   :  { %v1861_v20 = vpop.f32.mrf.mxu0 }
 0x110   :  { %v338_v21 = vadd.f32 %v335_v19, %v2330_v18 }
 0x112   :  { %340 = vst.msk [vmem:[#allocation2] sm:$0xff] %vm339_vm4, %v338_v21 }
 0x113   :  { %341 = vst.msk [vmem:[#allocation3] sm:$0xff] %vm181_vm2, %v338_v21 }
 0x11a   :  { %v342_v22 = vld [vmem:[#allocation3] sm:$0xff] }
 0x11b   :  { %1871 = vmatmul.mubr.msk.f32.vlgmr.msra.gmra.mxu0 %vm181_vm2, %v342_v22 }
 0x11c   :  { %1874 = vmatpush3.msra.mxu0 %v2299_v8  ;;  %1877 = vmatprep.mubr.msk.f32.mxu0 %vm2190_vm0, %v2189_v0 }
 0x11d   :  { %1875 = vmatprep.subr.mxu0 %v2189_v0 }
 0x11e   :  { %1876 = vmatpush3.msra.mxu0 %v2305_v10 }
 0x11f   :  { %1878 = vmatmul.mubr.msk.f32.vlgmr.msra.gmra.mxu0 %vm264_vm3, %v1729_v23  ;;  %1891 = vmatprep.subr.mxu0 %v2189_v0 }
 0x120   :  { %1892 = vmatpush3.msra.mxu0 %v2299_v8  ;;  %1895 = vmatprep.mubr.msk.f32.mxu0 %vm2190_vm0, %v2189_v0 }
 0x121   :  { %1893 = vmatprep.subr.mxu0 %v2189_v0 }
 0x122   :  { %1894 = vmatpush3.msra.mxu0 %v2305_v10 }
 0x123   :  { %1898 = vmatprep.subr.mxu0 %v2189_v0  ;;  %1896 = vmatmul.mubr.msk.f32.vlgmr.msra.gmra.mxu0 %vm264_vm3, %v1732_v24  ;;  %v1750_v24 = vld [vmem:[%s2602_s8] ss:$0 sm:$0xff] }
 0x124   :  { %1899 = vmatpush3.msra.mxu0 %v2274_v3  ;;  %1906 = vmatprep.mubr.msk.f32.mxu0 %vm2190_vm0, %v2189_v0 }
 0x125   :  { %1900 = vmatprep.subr.mxu0 %v2189_v0 }
 0x126   :  { %1901 = vmatpush3.msra.mxu0 %v2278_v4 }
 0x127   :  { %1902 = vmatprep.subr.mxu0 %v2189_v0 }
 0x128   :  { %1903 = vmatpush3.msra.mxu0 %v2285_v6 }
 0x129   :  { %1904 = vmatprep.subr.mxu0 %v2189_v0 }
 0x12a   :  { %1905 = vmatpush3.msra.mxu0 %v2291_v7 }
 0x12b   :  { %1927 = vmatprep.subr.mxu0 %v2189_v0 }
 0x1db   :  { %v420_v25 = vpop.f32.mrf.mxu0 }
 0x1dd   :  { %v1872_v26 = vpop.f32.mrf.mxu0 }
 0x1df   :  { %v493_v27 = vpop.f32.mrf.mxu0 }
 0x1e0   :  { %v494_v28 = vadd.f32 %v493_v27, %v420_v25 }
 0x1e1   :  { %v1879_v29 = vpop.f32.mrf.mxu0 }
 0x1e2   :  { %v497_v30 = vadd.f32 %v494_v28, %v2330_v18 }
 0x1e3   :  { %v651_v32 = vpop.f32.mrf.mxu0 }
 0x1e4   :  { %498 = vst.msk [vmem:[#allocation2 + $0x8] sm:$0xff] %vm339_vm4, %v497_v30 }
 0x1e5   :  { %499 = vst.msk [vmem:[#allocation3] sm:$0xff] %vm181_vm2, %v497_v30  ;;  %v1897_v33 = vpop.f32.mrf.mxu0 }
 0x1ec   :  { %v500_v31 = vld [vmem:[#allocation3] sm:$0xff] }
 0x1ed   :  { %1889 = vmatmul.mubr.msk.f32.vlgmr.msra.gmra.mxu1 %vm181_vm2, %v500_v31 }
 0x1ee   :  { %1910 = vmatpush3.msra.mxu1 %v2299_v8  ;;  %1913 = vmatprep.mubr.msk.f32.mxu1 %vm2190_vm0, %v2189_v0 }
 0x1ef   :  { %1911 = vmatprep.subr.mxu1 %v2189_v0 }
 0x1f0   :  { %1912 = vmatpush3.msra.mxu1 %v2305_v10 }
 0x1f1   :  { %1916 = vmatprep.subr.mxu1 %v2189_v0  ;;  %1914 = vmatmul.mubr.msk.f32.vlgmr.msra.gmra.mxu1 %vm264_vm3, %v1735_v34 }
 0x1f2   :  { %1917 = vmatpush3.msra.mxu1 %v2274_v3  ;;  %1924 = vmatprep.mubr.msk.f32.mxu1 %vm2190_vm0, %v2189_v0 }
 0x1f3   :  { %1918 = vmatprep.subr.mxu1 %v2189_v0 }
 0x1f4   :  { %1919 = vmatpush3.msra.mxu1 %v2278_v4 }
 0x1f5   :  { %1920 = vmatprep.subr.mxu1 %v2189_v0 }
 0x1f6   :  { %1921 = vmatpush3.msra.mxu1 %v2285_v6 }
 0x1f7   :  { %1922 = vmatprep.subr.mxu1 %v2189_v0 }
 0x1f8   :  { %1923 = vmatpush3.msra.mxu1 %v2291_v7 }
 0x1f9   :  { %1945 = vmatprep.subr.mxu1 %v2189_v0 }
 0x2ad   :  { %v578_v35 = vpop.f32.mrf.mxu1 }
 0x2ae   :  { %v652_v36 = vadd.f32 %v651_v32, %v578_v35 }
 0x2af   :  { %v1890_v37 = vpop.f32.mrf.mxu1 }
 0x2b0   :  { %v655_v38 = vadd.f32 %v652_v36, %v2330_v18 }
 0x2b1   :  { %v809_v40 = vpop.f32.mrf.mxu1 }
 0x2b2   :  { %656 = vst.msk [vmem:[#allocation2 + $0x10] sm:$0xff] %vm339_vm4, %v655_v38 }
 0x2b3   :  { %657 = vst.msk [vmem:[#allocation3] sm:$0xff] %vm181_vm2, %v655_v38  ;;  %v1915_v41 = vpop.f32.mrf.mxu1 }
 0x2b9   :  { %v1452_v9 = vld [vmem:[#allocation2 + $0x10] sm:$0xff] }
 0x2ba   :  { %v658_v39 = vld [vmem:[#allocation3] sm:$0xff] }
 0x2bb   :  { %1907 = vmatmul.mubr.msk.f32.vlgmr.msra.gmra.mxu0 %vm181_vm2, %v658_v39 }
 0x2bc   :  { %1928 = vmatpush3.msra.mxu0 %v2299_v8  ;;  %1931 = vmatprep.mubr.msk.f32.mxu0 %vm2190_vm0, %v2189_v0 }
 0x2bd   :  { %1929 = vmatprep.subr.mxu0 %v2189_v0 }
 0x2be   :  { %1930 = vmatpush3.msra.mxu0 %v2305_v10 }
 0x2bf   :  { %1934 = vmatprep.subr.mxu0 %v2189_v0  ;;  %1932 = vmatmul.mubr.msk.f32.vlgmr.msra.gmra.mxu0 %vm264_vm3, %v1738_v42 }
 0x2c0   :  { %1935 = vmatpush3.msra.mxu0 %v2274_v3  ;;  %1942 = vmatprep.mubr.msk.f32.mxu0 %vm2190_vm0, %v2189_v0 }
 0x2c1   :  { %1936 = vmatprep.subr.mxu0 %v2189_v0 }
 0x2c2   :  { %1937 = vmatpush3.msra.mxu0 %v2278_v4 }
 0x2c3   :  { %1938 = vmatprep.subr.mxu0 %v2189_v0 }
 0x2c4   :  { %1939 = vmatpush3.msra.mxu0 %v2285_v6 }
 0x2c5   :  { %1940 = vmatprep.subr.mxu0 %v2189_v0 }
 0x2c6   :  { %1941 = vmatpush3.msra.mxu0 %v2291_v7 }
 0x2c7   :  { %1963 = vmatprep.subr.mxu0 %v2189_v0 }
 0x37b   :  { %v736_v43 = vpop.f32.mrf.mxu0 }
 0x37c   :  { %v810_v44 = vadd.f32 %v809_v40, %v736_v43 }
 0x37d   :  { %v1908_v45 = vpop.f32.mrf.mxu0 }
 0x37e   :  { %v813_v46 = vadd.f32 %v810_v44, %v2330_v18 }
 0x37f   :  { %v967_v48 = vpop.f32.mrf.mxu0 }
 0x380   :  { %814 = vst.msk [vmem:[#allocation2 + $0x18] sm:$0xff] %vm339_vm4, %v813_v46 }
 0x381   :  { %815 = vst.msk [vmem:[#allocation3] sm:$0xff] %vm181_vm2, %v813_v46  ;;  %v1933_v49 = vpop.f32.mrf.mxu0 }
 0x388   :  { %v816_v47 = vld [vmem:[#allocation3] sm:$0xff] }
 0x389   :  { %1925 = vmatmul.mubr.msk.f32.vlgmr.msra.gmra.mxu1 %vm181_vm2, %v816_v47 }
 0x38a   :  { %1946 = vmatpush3.msra.mxu1 %v2299_v8  ;;  %1949 = vmatprep.mubr.msk.f32.mxu1 %vm2190_vm0, %v2189_v0 }
 0x38b   :  { %1947 = vmatprep.subr.mxu1 %v2189_v0 }
 0x38c   :  { %1948 = vmatpush3.msra.mxu1 %v2305_v10 }
 0x38d   :  { %1952 = vmatprep.subr.mxu1 %v2189_v0  ;;  %1950 = vmatmul.mubr.msk.f32.vlgmr.msra.gmra.mxu1 %vm264_vm3, %v1741_v50 }
 0x38e   :  { %1953 = vmatpush3.msra.mxu1 %v2274_v3  ;;  %1960 = vmatprep.mubr.msk.f32.mxu1 %vm2190_vm0, %v2189_v0 }
 0x38f   :  { %1954 = vmatprep.subr.mxu1 %v2189_v0 }
 0x390   :  { %1955 = vmatpush3.msra.mxu1 %v2278_v4 }
 0x391   :  { %1956 = vmatprep.subr.mxu1 %v2189_v0 }
 0x392   :  { %1957 = vmatpush3.msra.mxu1 %v2285_v6 }
 0x393   :  { %1958 = vmatprep.subr.mxu1 %v2189_v0 }
 0x394   :  { %1959 = vmatpush3.msra.mxu1 %v2291_v7 }
 0x395   :  { %1981 = vmatprep.subr.mxu1 %v2189_v0 }
 0x449   :  { %v894_v51 = vpop.f32.mrf.mxu1 }
 0x44a   :  { %v968_v52 = vadd.f32 %v967_v48, %v894_v51 }
 0x44b   :  { %v1926_v53 = vpop.f32.mrf.mxu1 }
 0x44c   :  { %v971_v54 = vadd.f32 %v968_v52, %v2330_v18 }
 0x44d   :  { %v1125_v56 = vpop.f32.mrf.mxu1 }
 0x44e   :  { %972 = vst.msk [vmem:[#allocation2 + $0x20] sm:$0xff] %vm339_vm4, %v971_v54 }
 0x44f   :  { %973 = vst.msk [vmem:[#allocation3] sm:$0xff] %vm181_vm2, %v971_v54  ;;  %v1951_v57 = vpop.f32.mrf.mxu1 }
 0x455   :  { %v1454_v11 = vld [vmem:[#allocation2 + $0x20] sm:$0xff] }
 0x456   :  { %v974_v55 = vld [vmem:[#allocation3] sm:$0xff] }
 0x457   :  { %1943 = vmatmul.mubr.msk.f32.vlgmr.msra.gmra.mxu0 %vm181_vm2, %v974_v55 }
 0x458   :  { %1964 = vmatpush3.msra.mxu0 %v2299_v8  ;;  %1967 = vmatprep.mubr.msk.f32.mxu0 %vm2190_vm0, %v2189_v0 }
 0x459   :  { %1965 = vmatprep.subr.mxu0 %v2189_v0 }
 0x45a   :  { %1966 = vmatpush3.msra.mxu0 %v2305_v10 }
 0x45b   :  { %1970 = vmatprep.subr.mxu0 %v2189_v0  ;;  %1968 = vmatmul.mubr.msk.f32.vlgmr.msra.gmra.mxu0 %vm264_vm3, %v1744_v58 }
 0x45c   :  { %1971 = vmatpush3.msra.mxu0 %v2274_v3  ;;  %1978 = vmatprep.mubr.msk.f32.mxu0 %vm2190_vm0, %v2189_v0  ;;  %v1462_v3 = vld [vmem:[%s2601_s7 + $0x20] sm:$0xff] }
 0x45d   :  { %1972 = vmatprep.subr.mxu0 %v2189_v0 }
 0x45e   :  { %1973 = vmatpush3.msra.mxu0 %v2278_v4  ;;  %v1450_v4 = vld [vmem:[#allocation2] sm:$0xff] }
 0x45f   :  { %1974 = vmatprep.subr.mxu0 %v2189_v0 }
 0x460   :  { %1975 = vmatpush3.msra.mxu0 %v2285_v6  ;;  %v1459_v6 = vld [vmem:[%s2601_s7 + $0x8] sm:$0xff] }
 0x461   :  { %1976 = vmatprep.subr.mxu0 %v2189_v0 }
 0x462   :  { %1977 = vmatpush3.msra.mxu0 %v2291_v7  ;;  %v1458_v7 = vld [vmem:[%s2601_s7] sm:$0xff] }
 0x517   :  { %v1052_v59 = vpop.f32.mrf.mxu0 }
 0x518   :  { %v1126_v60 = vadd.f32 %v1125_v56, %v1052_v59 }
 0x519   :  { %v1944_v61 = vpop.f32.mrf.mxu0 }
 0x51a   :  { %v1129_v62 = vadd.f32 %v1126_v60, %v2330_v18 }
 0x51b   :  { %v1283_v13 = vpop.f32.mrf.mxu0 }
 0x51c   :  { %1130 = vst.msk [vmem:[#allocation2 + $0x28] sm:$0xff] %vm339_vm4, %v1129_v62 }
 0x51d   :  { %1131 = vst.msk [vmem:[#allocation3] sm:$0xff] %vm181_vm2, %v1129_v62  ;;  %v1969_v14 = vpop.f32.mrf.mxu0 }
 0x523   :  { %v1455_v12 = vld [vmem:[#allocation2 + $0x28] sm:$0xff] }
 0x524   :  { %v1132_v63 = vld [vmem:[#allocation3] sm:$0xff] }
 0x525   :  { %1961 = vmatmul.mubr.msk.f32.vlgmr.msra.gmra.mxu1 %vm181_vm2, %v1132_v63 }
 0x526   :  { %1982 = vmatpush3.msra.mxu1 %v2299_v8  ;;  %1985 = vmatprep.mubr.msk.f32.mxu1 %vm2190_vm0, %v2189_v0  ;;  %v1451_v8 = vld [vmem:[#allocation2 + $0x8] sm:$0xff] }
 0x527   :  { %1983 = vmatprep.subr.mxu1 %v2189_v0  ;;  %v1460_v0 = vld [vmem:[%s2601_s7 + $0x10] sm:$0xff] }
 0x528   :  { %1984 = vmatpush3.msra.mxu1 %v2305_v10  ;;  %v1453_v10 = vld [vmem:[#allocation2 + $0x18] sm:$0xff] }
 0x529   :  { %1988 = vmatprep.subr.mxu1 %v1463_v1  ;;  %1986 = vmatmul.mubr.msk.f32.vlgmr.msra.gmra.mxu1 %vm264_vm3, %v1747_v2 }
 0x52a   :  { %1989 = vmatpush3.msra.mxu1 %v1463_v1  ;;  %2000 = vmatprep.mubr.msk.f32.mxu1 %vm339_vm4, %v1450_v4 }
 0x52b   :  { %1990 = vmatprep.subr.mxu1 %v1462_v3 }
 0x52c   :  { %1991 = vmatpush3.msra.mxu1 %v1462_v3 }
 0x52d   :  { %1992 = vmatprep.subr.mxu1 %v1461_v5 }
 0x52e   :  { %1993 = vmatpush3.msra.mxu1 %v1461_v5 }
 0x52f   :  { %1994 = vmatprep.subr.mxu1 %v1460_v0 }
 0x530   :  { %1995 = vmatpush3.msra.mxu1 %v1460_v0 }
 0x531   :  { %1996 = vmatprep.subr.mxu1 %v1459_v6 }
 0x532   :  { %1997 = vmatpush3.msra.mxu1 %v1459_v6 }
 0x533   :  { %1998 = vmatprep.subr.mxu1 %v1458_v7 }
 0x534   :  { %1999 = vmatpush3.msra.mxu1 %v1458_v7 }
 0x535   :  { %2001 = vmatmul.mubr.msk.f32.vlgmr.msra.gmra.mxu1 %vm339_vm4, %v1451_v8 }
 0x536   :  { %2003 = vmatprep.mubr.msk.f32.mxu1 %vm339_vm4, %v1452_v9 }
 0x539   :  { %2004 = vmatmul.mubr.msk.f32.gmra.mxu1 %vm339_vm4, %v1453_v10 }
 0x53a   :  { %2006 = vmatprep.mubr.msk.f32.mxu1 %vm339_vm4, %v1454_v11 }
 0x53d   :  { %2007 = vmatmul.mubr.msk.f32.gmra.mxu1 %vm339_vm4, %v1455_v12 }
 0x5e5   :  { %v1210_v15 = vpop.f32.mrf.mxu1 }
 0x5e6   :  { %v1284_v16 = vadd.f32 %v1283_v13, %v1210_v15 }
 0x5e7   :  { %v1962_v17 = vpop.f32.mrf.mxu1 }
 0x5e8   :  { %v1287_v19 = vadd.f32 %v1284_v16, %v2330_v18 }
 0x5e9   :  { %v1441_v20 = vpop.f32.mrf.mxu1 }
 0x5ea   :  { %1288 = vst.msk [vmem:[#allocation2 + $0x30] sm:$0xff] %vm339_vm4, %v1287_v19 }
 0x5eb   :  { %1289 = vst.msk [vmem:[#allocation3] sm:$0xff] %vm181_vm2, %v1287_v19  ;;  %v1987_v21 = vpop.f32.mrf.mxu1 }
 0x5f1   :  { %v1456_v23 = vld [vmem:[#allocation2 + $0x30] sm:$0xff] }
 0x5f2   :  { %v1290_v22 = vld [vmem:[#allocation3] sm:$0xff]  ;;  %2009 = vmatprep.mubr.msk.f32.mxu1 %vm339_vm4, %v1456_v23 }
 0x5f3   :  { %1979 = vmatmul.mubr.msk.f32.vlgmr.msra.gmra.mxu0 %vm181_vm2, %v1290_v22 }
 0x5f5   :  { %v2002_v25 = vpop.f32.mrf.mxu1 }
 0x5f6   :  { %v1567_v26 = vadd.f32 %v2002_v25, %v1750_v24 }
 0x5f7   :  { %v1561_v27 = vpop.f32.mrf.mxu1 }
 0x5f8   :  { %v1562_v28 = vadd.f32 %v1750_v24, %v1561_v27  ;;  %v1603_v29 = vsel %vm264_vm3, %v1567_v26, -inf }
 0x5f9   :  { %1604 = vmax.xlane.f32.xlu0 %v1603_v29  ;;  %v2005_v30 = vpop.f32.mrf.mxu1 }
 0x5fa   :  { %v1577_v31 = vadd.f32 %v2005_v30, %v1750_v24  ;;  %v1600_v35 = vsel %vm264_vm3, %v1562_v28, -inf }
 0x5fb   :  { %v1571_v32 = vpop.f32.mrf.mxu1 }
 0x5fc   :  { %v1572_v33 = vadd.f32 %v1750_v24, %v1571_v32  ;;  %v1609_v34 = vsel %vm264_vm3, %v1577_v31, -inf }
 0x5fd   :  { %1610 = vmax.xlane.f32.xlu1 %v1609_v34  ;;  %1601 = vmax.xlane.f32.xlu0 %v1600_v35  ;;  %v2008_v36 = vpop.f32.mrf.mxu1 }
 0x5fe   :  { %v1587_v38 = vadd.f32 %v2008_v36, %v1750_v24  ;;  %v1606_v40 = vsel %vm264_vm3, %v1572_v33, -inf }
 0x5ff   :  { %v1581_v37 = vpop.f32.mrf.mxu1 }
 0x600   :  { %v1582_v39 = vadd.f32 %v1750_v24, %v1581_v37  ;;  %v1615_v42 = vsel %vm264_vm3, %v1587_v38, -inf }
 0x601   :  { %1607 = vmax.xlane.f32.xlu1 %v1606_v40 }
 0x602   :  { %v1612_v41 = vsel %vm264_vm3, %v1582_v39, -inf }
 0x603   :  { %1613 = vmax.xlane.f32.xlu0 %v1612_v41 }
 0x605   :  { %1616 = vmax.xlane.f32.xlu1 %v1615_v42 }
 0x682   :  { %v1605_v49 = vpop.xlane.xlu0 %1604 }
 0x683   :  { %v2517_v53 = vsub.f32 %v1567_v26, %v1605_v49 }
 0x686   :  { %v1611_v50 = vpop.xlane.xlu1 %1610  ;;  %v1602_v51 = vpop.xlane.xlu0 %1601 }
 0x687   :  { %v2519_v54 = vsub.f32 %v1562_v28, %v1602_v51  ;;  %v2522_v55 = vsub.f32 %v1577_v31, %v1611_v50 }
 0x689   :  { %v1632_v57 = vmul.f32 1.442695, %v2519_v54  ;;  %v1638_v60 = vmul.f32 1.442695, %v2522_v55 }
 0x68a   :  { %v1608_v52 = vpop.xlane.xlu1 %1607 }
 0x68b   :  { %v2525_v58 = vsub.f32 %v1572_v33, %v1608_v52 }
 0x68c   :  { %v1614_v59 = vpop.xlane.xlu0 %1613 }
 0x68d   :  { %v1636_v62 = vmul.f32 1.442695, %v2525_v58  ;;  %v2531_v63 = vsub.f32 %v1582_v39, %v1614_v59 }
 0x68e   :  { %v1617_v56 = vpop.xlane.xlu1 %1616 }
 0x68f   :  { %v2528_v61 = vsub.f32 %v1587_v38, %v1617_v56  ;;  %v1640_v2 = vmul.f32 1.442695, %v2531_v63 }
 0x691   :  { %v1642_v1 = vmul.f32 1.442695, %v2528_v61 }
 0x6b3   :  { %v1368_v43 = vpop.f32.mrf.mxu0 }
 0x6b4   :  { %v1442_v44 = vadd.f32 %v1441_v20, %v1368_v43 }
 0x6b5   :  { %v1980_v45 = vpop.f32.mrf.mxu0 }
 0x6b6   :  { %v1445_v46 = vadd.f32 %v1442_v44, %v2330_v18  ;;  %v1634_v18 = vmul.f32 1.442695, %v2517_v53 }
 0x6b8   :  { %1446 = vst.msk [vmem:[#allocation2 + $0x38] sm:$0xff] %vm339_vm4, %v1445_v46  ;;  %2022 = vpow2.f32 %v1634_v18 }
 0x6b9   :  { %1447 = vst.msk [vmem:[#allocation3] sm:$0xff] %vm181_vm2, %v1445_v46  ;;  %2024 = vpow2.f32 %v1632_v57 }
 0x6ba   :  { %2026 = vpow2.f32 %v1638_v60 }
 0x6bb   :  { %2028 = vpow2.f32 %v1636_v62 }
 0x6bc   :  { %2030 = vpow2.f32 %v1642_v1 }
 0x6bd   :  { %2032 = vpow2.f32 %v1640_v2 }
 0x6bf   :  { %v1457_v47 = vld [vmem:[#allocation2 + $0x38] sm:$0xff] }
 0x6c0   :  { %v1448_v48 = vld [vmem:[#allocation3] sm:$0xff]  ;;  %2010 = vmatmul.mubr.msk.f32.gmra.mxu1 %vm339_vm4, %v1457_v47 }
 0x6c1   :  { %1449 = vst.msk [vmem:[#allocation13] sm:$0xff] %vm181_vm2, %v1448_v48 }
 0x6c5   :  { %v2023_v7 = vpop.eup %2022 }
 0x6c6   :  { %v2025_v9 = vpop.eup %2024  ;;  %v1651_v10 = vsel %vm264_vm3, %v2023_v7, 0.0 }
 0x6c7   :  { %v2027_v11 = vpop.eup %2026  ;;  %v1648_v12 = vsel %vm264_vm3, %v2025_v9, 0.0 }
 0x6c8   :  { %v2029_v13 = vpop.eup %2028  ;;  %v1657_v14 = vsel %vm264_vm3, %v2027_v11, 0.0 }
 0x6c9   :  { %v2031_v15 = vpop.eup %2030  ;;  %v1654_v16 = vsel %vm264_vm3, %v2029_v13, 0.0 }
 0x6ca   :  { %v2033_v17 = vpop.eup %2032  ;;  %v1663_v19 = vsel %vm264_vm3, %v2031_v15, 0.0 }
 0x6cb   :  { %v1660_v20 = vsel %vm264_vm3, %v2033_v17, 0.0 }
 0x780   :  { %v2011_v3 = vpop.f32.mrf.mxu1 }
 0x781   :  { %v1597_v4 = vadd.f32 %v2011_v3, %v1750_v24 }
 0x782   :  { %v1591_v5 = vpop.f32.mrf.mxu1 }
 0x783   :  { %v1592_v0 = vadd.f32 %v1750_v24, %v1591_v5  ;;  %v1621_v6 = vsel %vm264_vm3, %v1597_v4, -inf }
 0x784   :  { %1622 = vmax.xlane.f32.xlu1 %v1621_v6 }
 0x785   :  { %v1618_v8 = vsel %vm264_vm3, %v1592_v0, -inf }
 0x786   :  { %1619 = vmax.xlane.f32.xlu0 %v1618_v8 }
 0x788   :  { %1652 = vadd.xlane.f32.xlu1 %v1651_v10 }
 0x78a   :  { %1649 = vadd.xlane.f32.xlu0 %v1648_v12 }
 0x78c   :  { %1658 = vadd.xlane.f32.xlu1 %v1657_v14 }
 0x78e   :  { %1655 = vadd.xlane.f32.xlu0 %v1654_v16 }
 0x790   :  { %1664 = vadd.xlane.f32.xlu1 %v1663_v19 }
 0x792   :  { %1661 = vadd.xlane.f32.xlu0 %v1660_v20 }
 0x80d   :  { %v1623_v21 = vpop.xlane.xlu1 %1622 }
 0x80e   :  { %v2543_v22 = vsub.f32 %v1597_v4, %v1623_v21 }
 0x80f   :  { %v1620_v23 = vpop.xlane.xlu0 %1619 }
 0x810   :  { %v1646_v24 = vmul.f32 1.442695, %v2543_v22  ;;  %v2546_v25 = vsub.f32 %v1592_v0, %v1620_v23 }
 0x811   :  { %v1653_v26 = vpop.xlane.xlu1 %1652 }
 0x812   :  { %2034 = vpow2.f32 %v1646_v24  ;;  %v1644_v27 = vmul.f32 1.442695, %v2546_v25 }
 0x813   :  { %2036 = vlog2.f32 %v1653_v26  ;;  %v1650_v28 = vpop.xlane.xlu0 %1649 }
 0x814   :  { %2038 = vpow2.f32 %v1644_v27 }
 0x815   :  { %2040 = vlog2.f32 %v1650_v28  ;;  %v1659_v29 = vpop.xlane.xlu1 %1658 }
 0x816   :  { %2042 = vlog2.f32 %v1659_v29 }
 0x817   :  { %v1656_v30 = vpop.xlane.xlu0 %1655 }
 0x818   :  { %2044 = vlog2.f32 %v1656_v30 }
 0x819   :  { %v1665_v31 = vpop.xlane.xlu1 %1664 }
 0x81a   :  { %2046 = vlog2.f32 %v1665_v31 }
 0x81b   :  { %v1662_v32 = vpop.xlane.xlu0 %1661 }
 0x81c   :  { %2048 = vlog2.f32 %v1662_v32 }
 0x81f   :  { %v2035_v33 = vpop.eup %2034 }
 0x820   :  { %v2037_v34 = vpop.eup %2036  ;;  %v1669_v35 = vsel %vm264_vm3, %v2035_v33, 0.0 }
 0x821   :  { %v2039_v36 = vpop.eup %2038  ;;  %v1675_v37 = vmul.f32 0.6931472, %v2037_v34  ;;  %1670 = vadd.xlane.f32.xlu1 %v1669_v35 }
 0x822   :  { %v2041_v38 = vpop.eup %2040  ;;  %v1666_v39 = vsel %vm264_vm3, %v2039_v36, 0.0 }
 0x823   :  { %v2043_v40 = vpop.eup %2042  ;;  %v1689_v41 = vsub.f32 %v2517_v53, %v1675_v37  ;;  %v1673_v42 = vmul.f32 0.6931472, %v2041_v38  ;;  %1667 = vadd.xlane.f32.xlu0 %v1666_v39 }
 0x824   :  { %v1679_v43 = vmul.f32 0.6931472, %v2043_v40 }
 0x825   :  { %v2045_v44 = vpop.eup %2044  ;;  %1697 = vst.msk [vmem:[%s2603_s9 + $0x8] sm:$0xff] %vm264_vm3, %v1689_v41  ;;  %v1688_v45 = vsub.f32 %v2519_v54, %v1673_v42 }
 0x826   :  { %v1691_v46 = vsub.f32 %v2522_v55, %v1679_v43  ;;  %v1677_v47 = vmul.f32 0.6931472, %v2045_v44 }
 0x827   :  { %v2047_v48 = vpop.eup %2046  ;;  %1696 = vst.msk [vmem:[%s2603_s9] sm:$0xff] %vm264_vm3, %v1688_v45 }
 0x828   :  { %1699 = vst.msk [vmem:[%s2603_s9 + $0x18] sm:$0xff] %vm264_vm3, %v1691_v46  ;;  %v1690_v49 = vsub.f32 %v2525_v58, %v1677_v47  ;;  %v1683_v50 = vmul.f32 0.6931472, %v2047_v48 }
 0x829   :  { %v2049_v51 = vpop.eup %2048 }
 0x82a   :  { %1698 = vst.msk [vmem:[%s2603_s9 + $0x10] sm:$0xff] %vm264_vm3, %v1690_v49  ;;  %v1693_v52 = vsub.f32 %v2528_v61, %v1683_v50  ;;  %v1681_v53 = vmul.f32 0.6931472, %v2049_v51 }
 0x82c   :  { %1701 = vst.msk [vmem:[%s2603_s9 + $0x28] sm:$0xff] %vm264_vm3, %v1693_v52  ;;  %v1692_v54 = vsub.f32 %v2531_v63, %v1681_v53 }
 0x82e   :  { %1700 = vst.msk [vmem:[%s2603_s9 + $0x20] sm:$0xff] %vm264_vm3, %v1692_v54 }
 0x82f   :  { %2165 = shalt.err (!%p2162_p1)
}
 0x830   :  { %1715 = dma.vmem_to_hbm [thread:$0]  %s1713_s29, 128, %s2604_s10, [#allocation6]  }
 0x8aa   :  { %v1671_v18 = vpop.xlane.xlu1 %1670 }
 0x8ab   :  { %2050 = vlog2.f32 %v1671_v18 }
 0x8ac   :  { %v1668_v55 = vpop.xlane.xlu0 %1667 }
 0x8ad   :  { %2052 = vlog2.f32 %v1668_v55 }
 0x8b8   :  { %v2051_v56 = vpop.eup %2050 }
 0x8b9   :  { %v1687_v57 = vmul.f32 0.6931472, %v2051_v56 }
 0x8ba   :  { %v2053_v58 = vpop.eup %2052 }
 0x8bb   :  { %v1695_v59 = vsub.f32 %v2543_v22, %v1687_v57  ;;  %v1685_v60 = vmul.f32 0.6931472, %v2053_v58 }
 0x8bd   :  { %1703 = vst.msk [vmem:[%s2603_s9 + $0x38] sm:$0xff] %vm264_vm3, %v1695_v59  ;;  %v1694_v61 = vsub.f32 %v2546_v25, %v1685_v60 }
 0x8bf   :  { %1702 = vst.msk [vmem:[%s2603_s9 + $0x30] sm:$0xff] %vm264_vm3, %v1694_v61 }
 0x8c0   :  { %2180 = dma.done.wait [#allocation6], 128  }
 0x8c1   :  { %2181 = vsyncadd [#allocation6], 4294967168 }
 0x8c2   :  { %1721 = vsyncpa [#allocation5], 1 }
 0x8c3   :  { %1722 = vsyncpa [#allocation8], 1 }
 0x8c4   :  { %1723 = vsyncpa [#allocation11], 1 }
 0x8c5   :  { %1724 = vsyncpa [#allocation6], 1 }

</bundles_post_ra>
